<compile_context>
chip_gen: v5e
topology: v5e:2x2
jax: 0.10.0
libtpu: 0.0.40
codegen_flags: <defaults>
</compile_context>

<pallas_src>
import jax
import jax.numpy as jnp
from jax.experimental import pallas as pl
from jax.experimental.pallas import tpu as pltpu


def _round_up(x, m):
    return (x + m - 1) // m * m


# --------------------------------------------------------------------------
# Kernel: one (tm, tn) output tile, accumulated over the K grid axis.
# --------------------------------------------------------------------------
def _linear_kernel(x_ref, wt_ref, b_ref, o_ref, acc_ref):
    # x_ref : (tm, tk)  row/K tile of the flattened input (native dtype)
    # wt_ref: (tk, tn)  K/N tile of W^T                   (native dtype)
    # b_ref : (1,  tn)  N tile of the (padded) bias
    # o_ref : (tm, tn)  output tile
    # acc_ref: (tm, tn) f32 accumulator, persists across the K axis
    @pl.when(pl.program_id(2) == 0)
    def _():
        acc_ref[...] = jnp.zeros_like(acc_ref)

    acc_ref[...] += jnp.dot(x_ref[...], wt_ref[...],
                            preferred_element_type=jnp.float32)

    @pl.when(pl.program_id(2) == pl.num_programs(2) - 1)
    def _():
        o_ref[...] = (acc_ref[...] + b_ref[...].astype(jnp.float32)
                      ).astype(o_ref.dtype)


# --------------------------------------------------------------------------
# Tiling helpers
# --------------------------------------------------------------------------
def _device_kind():
    try:
        return jax.devices()[0].device_kind.lower()
    except Exception:
        return ""


def _pick_tk(dim_in):
    # Only split K when a 128-multiple tile divides dim_in exactly, so a
    # partial K block never feeds garbage into the accumulator.
    for cand in (1024, 512, 256, 128):
        if dim_in % cand == 0:
            return cand
    return dim_in          # single full-K block


def _pick_tn(n_pad):
    if n_pad <= 512:
        return n_pad
    for cand in (512, 256, 128):
        if n_pad % cand == 0:
            return cand
    return 128             # always divides n_pad (n_pad is a 128 multiple)


# --------------------------------------------------------------------------
# Forward wrapper (same semantics as IgnoreLinear.forward(t, x))
# --------------------------------------------------------------------------
def ignore_linear_forward(t, x, params):
    """y = x @ W.T + b ; `t` is accepted and ignored, like the PyTorch module."""
    del t                                   # IgnoreLinear drops the time input.

    w_t = params["w_t"]                     # (dim_in, n_pad), packed at init
    b_p = params["b_p"]                     # (1, n_pad),      packed at init
    dim_out = params["b"].shape[0]
    dim_in, n_pad = w_t.shape

    leading = x.shape[:-1]
    assert x.shape[-1] == dim_in
    x2 = x.reshape(-1, dim_in)              # no dtype cast: native MXU path
    m = x2.shape[0]
    out_dtype = jnp.result_type(x.dtype, w_t.dtype)

    # ---- tiling (generation aware) ----
    kind = _device_kind()
    is_v7 = "v7" in kind
    row_cap = 256 if is_v7 else 512         # v7x: 64 MiB VMEM, 2 TCs
    tm = min(_round_up(m, 8), row_cap)
    if is_v7 and pl.cdiv(m, tm) < 2 and m > 8:
        tm = _round_up(pl.cdiv(m, 2), 8)    # >= 2 row tiles -> both v7x cores busy
    tk = _pick_tk(dim_in)
    tn = _pick_tn(n_pad)
    grid = (pl.cdiv(m, tm), pl.cdiv(n_pad, tn), pl.cdiv(dim_in, tk))

    # ---- explicit VMEM budget (double-buffered tiles + f32 accumulator) ----
    xsz = x2.dtype.itemsize
    wsz = w_t.dtype.itemsize
    bsz = b_p.dtype.itemsize
    osz = jnp.dtype(out_dtype).itemsize
    needed = (2 * tm * tk * xsz + 2 * tk * tn * wsz + 2 * 8 * tn * bsz
              + 2 * tm * tn * osz + tm * tn * 4)
    vmem_limit = int(min(max(2 * needed, 32 << 20), 60 << 20))

    cost = pl.CostEstimate(
        flops=2 * m * dim_in * n_pad,
        transcendentals=0,
        bytes_accessed=(m * dim_in * xsz + dim_in * n_pad * wsz
                        + n_pad * bsz + m * n_pad * osz),
    )

    out = pl.pallas_call(
        _linear_kernel,
        out_shape=jax.ShapeDtypeStruct((m, n_pad), out_dtype),
        grid_spec=pltpu.PrefetchScalarGridSpec(
            num_scalar_prefetch=0,
            grid=grid,
            in_specs=[
                pl.BlockSpec((tm, tk), lambda i, j, k: (i, k)),   # x row/K tile
                pl.BlockSpec((tk, tn), lambda i, j, k: (k, j)),   # W^T K/N tile
                pl.BlockSpec((1, tn), lambda i, j, k: (0, j)),    # bias N tile
            ],
            out_specs=pl.BlockSpec((tm, tn), lambda i, j, k: (i, j)),
            scratch_shapes=[pltpu.VMEM((tm, tn), jnp.float32)],
        ),
        compiler_params=pltpu.CompilerParams(
            dimension_semantics=("parallel", "parallel", "arbitrary"),
            vmem_limit_bytes=vmem_limit),
        cost_estimate=cost,
    )(x2, w_t, b_p)

    if n_pad != dim_out:                    # undo the lane padding added at init
        out = out[:, :dim_out]
    return out.reshape(*leading, dim_out)


# --------------------------------------------------------------------------
# Parameter packing / init (torch nn.Linear default init)
# --------------------------------------------------------------------------
def pack_params(w, b):
    """One-time layout work: transpose W and zero-pad dim_out to a 128 multiple."""
    dim_out, dim_in = w.shape
    n_pad = _round_up(dim_out, 128)                     # lane-dense output stores
    w_t = jnp.zeros((dim_in, n_pad), w.dtype).at[:, :dim_out].set(jnp.transpose(w))
    b_p = jnp.zeros((1, n_pad), b.dtype).at[:, :dim_out].set(b)
    return dict(w=w, b=b, w_t=w_t, b_p=b_p)


def init_params(key, dim_in, dim_out, dtype=jnp.float32):
    kw, kb = jax.random.split(key)
    bound = 1.0 / (dim_in ** 0.5)                       # torch nn.Linear default
    w = jax.random.uniform(kw, (dim_out, dim_in), dtype, -bound, bound)
    b = jax.random.uniform(kb, (dim_out,), dtype, -bound, bound)
    return pack_params(w, b)


def _reference_forward(t, x, params):
    del t
    return x @ params["w"].T + params["b"]


if __name__ == "__main__":
    key = jax.random.PRNGKey(0)
    kx, kp = jax.random.split(key)

    batch, dim_in, dim_out = 16, 32, 64
    x = jax.random.normal(kx, (batch, dim_in), jnp.float32)
    t = jnp.float32(0.5)                                # ignored by the module
    params = init_params(kp, dim_in, dim_out)

    out = jax.jit(ignore_linear_forward)(t, x, params)
    out = jax.block_until_ready(out)

    ref = _reference_forward(t, x, params)
    assert out.shape == ref.shape and out.dtype == ref.dtype
    err = float(jnp.max(jnp.abs(out - ref)))
    if not (err == err) or err > 1e-4:                  # NaN or too large
        raise AssertionError(f"kernel/reference mismatch: max abs err {err}")

    print("KERNEL_OK")
</pallas_src>

<mosaic_0001>
module attributes {stable_mosaic.version = 11 : i64} {
  func.func @_linear_kernel(%arg0: i32, %arg1: i32, %arg2: i32, %arg3: memref<16x32xf32, #tpu.memory_space<vmem>>, %arg4: memref<32x128xf32, #tpu.memory_space<vmem>>, %arg5: memref<1x128xf32, #tpu.memory_space<vmem>>, %arg6: memref<16x128xf32, #tpu.memory_space<vmem>>, %arg7: memref<16x128xf32, #tpu.memory_space<vmem>>) attributes {dimension_semantics = [#tpu.dimension_semantics<parallel>, #tpu.dimension_semantics<parallel>, #tpu.dimension_semantics<arbitrary>], iteration_bounds = array<i64: 1, 1, 1>, scalar_prefetch = 0 : i64, scratch_operands = 1 : i64, tpu.core_type = #tpu.core_type<tc>, window_params = [{transform_indices = @transform_0, window_bounds = array<i64: 16, 32>}, {transform_indices = @transform_1, window_bounds = array<i64: 32, 128>}, {transform_indices = @transform_2, window_bounds = array<i64: 1, 128>}, {transform_indices = @transform_3, window_bounds = array<i64: 16, 128>}]} {
    %c0_i32 = arith.constant 0 : i32
    %0 = arith.cmpi eq, %arg2, %c0_i32 : i32
    %1 = arith.extui %0 : i1 to i32
    %c0_i32_0 = arith.constant 0 : i32
    %2 = arith.cmpi ne, %1, %c0_i32_0 : i32
    scf.if %2 {
      %cst_10 = arith.constant 0.000000e+00 : f32
      %12 = vector.broadcast %cst_10 : f32 to vector<16x128xf32>
      %c0_11 = arith.constant 0 : index
      %c0_12 = arith.constant 0 : index
      %13 = vector.load %arg7[%c0_11, %c0_12] : memref<16x128xf32, #tpu.memory_space<vmem>>, vector<16x128xf32>
      tpu.vector_store %arg7[%c0_11, %c0_12], %12 {strides = array<i32>} : memref<16x128xf32, #tpu.memory_space<vmem>>, vector<16x128xf32>,
    } else {
    }
    %c0 = arith.constant 0 : index
    %c0_1 = arith.constant 0 : index
    %3 = vector.load %arg7[%c0, %c0_1] : memref<16x128xf32, #tpu.memory_space<vmem>>, vector<16x128xf32>
    %c0_2 = arith.constant 0 : index
    %c0_3 = arith.constant 0 : index
    %4 = vector.load %arg3[%c0_2, %c0_3] : memref<16x32xf32, #tpu.memory_space<vmem>>, vector<16x32xf32>
    %c0_4 = arith.constant 0 : index
    %c0_5 = arith.constant 0 : index
    %5 = vector.load %arg4[%c0_4, %c0_5] : memref<32x128xf32, #tpu.memory_space<vmem>>, vector<32x128xf32>
    %cst = arith.constant dense<0.000000e+00> : vector<16x128xf32>
    %6 = tpu.matmul %4, %5, %cst {dimension_numbers = #tpu.dot_dimension_numbers<[1], [0], [0], [1], [0, 0, 1, 1], [], []>} : vector<16x32xf32>, vector<32x128xf32>, vector<16x128xf32> -> vector<16x128xf32>
    %7 = arith.addf %3, %6 : vector<16x128xf32>
    %c0_6 = arith.constant 0 : index
    %c0_7 = arith.constant 0 : index
    %8 = vector.load %arg7[%c0_6, %c0_7] : memref<16x128xf32, #tpu.memory_space<vmem>>, vector<16x128xf32>
    tpu.vector_store %arg7[%c0_6, %c0_7], %7 {strides = array<i32>} : memref<16x128xf32, #tpu.memory_space<vmem>>, vector<16x128xf32>,
    %c0_i32_8 = arith.constant 0 : i32
    %9 = arith.cmpi eq, %arg2, %c0_i32_8 : i32
    %10 = arith.extui %9 : i1 to i32
    %c0_i32_9 = arith.constant 0 : i32
    %11 = arith.cmpi ne, %10, %c0_i32_9 : i32
    scf.if %11 {
      %c0_10 = arith.constant 0 : index
      %c0_11 = arith.constant 0 : index
      %12 = vector.load %arg7[%c0_10, %c0_11] : memref<16x128xf32, #tpu.memory_space<vmem>>, vector<16x128xf32>
      %c0_12 = arith.constant 0 : index
      %c0_13 = arith.constant 0 : index
      %13 = vector.load %arg5[%c0_12, %c0_13] : memref<1x128xf32, #tpu.memory_space<vmem>>, vector<1x128xf32>
      %14 = vector.broadcast %13 : vector<1x128xf32> to vector<16x128xf32>
      %15 = arith.addf %12, %14 : vector<16x128xf32>
      %c0_14 = arith.constant 0 : index
      %c0_15 = arith.constant 0 : index
      %16 = vector.load %arg6[%c0_14, %c0_15] : memref<16x128xf32, #tpu.memory_space<vmem>>, vector<16x128xf32>
      tpu.vector_store %arg6[%c0_14, %c0_15], %15 {strides = array<i32>} : memref<16x128xf32, #tpu.memory_space<vmem>>, vector<16x128xf32>,
    } else {
    }
    return
  }
  func.func @transform_0(%arg0: i32, %arg1: i32, %arg2: i32) -> (i32, i32) {
    %c0_i32 = arith.constant 0 : i32
    return %arg0, %arg2 : i32, i32
  }
  func.func @transform_1(%arg0: i32, %arg1: i32, %arg2: i32) -> (i32, i32) {
    %c0_i32 = arith.constant 0 : i32
    return %arg2, %arg1 : i32, i32
  }
  func.func @transform_2(%arg0: i32, %arg1: i32, %arg2: i32) -> (i32, i32) {
    %c0_i32 = arith.constant 0 : i32
    %c0_i32_0 = arith.constant 0 : i32
    return %c0_i32, %arg1 : i32, i32
  }
  func.func @transform_3(%arg0: i32, %arg1: i32, %arg2: i32) -> (i32, i32) {
    %c0_i32 = arith.constant 0 : i32
    return %arg0, %arg1 : i32, i32
  }
}

</mosaic_0001>

<bundles_post_ra>
// kernel: ignore_linear_forward.1
= control target key start
LH: loop header
LB: loop body
LE: loop exit
PB: predicated region body
PF: predicated region fallthrough
CT: control target
= control target key end

     0   :  { %8 = vsyncpa [#allocation4], 0  ;;  %s303_s0 = inlined_call_operand.hbm [shape: f32[16,32], index: 0, kind: input, shape index: {}]   ;;  %s304_s1 = inlined_call_operand.hbm [shape: f32[32,128], index: 1, kind: input, shape index: {}]   ;;  %s305_s2 = inlined_call_operand.hbm [shape: f32[1,128], index: 2, kind: input, shape index: {}]   ;;  %s306_s3 = inlined_call_operand.hbm [shape: f32[16,128], index: 3, kind: output, shape index: {}]  }
   0x1   :  { %9 = vsyncpa [#allocation7], 0 }
   0x2   :  { %10 = vsyncpa [#allocation5], 0  ;;  %s28_s14 = sshll.u32 %s304_s1, 4  ;;  %s256_s15 = smov [#allocation6]   ;;  %s29_s14 = int_to_ptr.hbm [resolvable:$true] %s28_s14 }
   0x3   :  { %s30_s16 = sshll.u32 %s256_s15, 4  ;;  %s15_s19 = sshll.u32 %s303_s0, 4  ;;  %s31_s16 = int_to_ptr.vmem [resolvable:$true] %s30_s16  ;;  %s16_s19 = int_to_ptr.hbm [resolvable:$true] %s15_s19 }
   0x4   :  { %s257_s20 = smov 128   ;;  %s258_s21 = smov 8  }
   0x5   :  { %36 = dma.hbm_to_vmem [thread:$0]  %s29_s14, 512, %s31_s16, [#allocation7], %s257_s20, %s257_s20, %s258_s21  }
   0x6   :  { %s259_s22 = smov [#allocation3]   ;;  %s42_s1 = sshll.u32 %s305_s2, 4  ;;  %s43_s1 = int_to_ptr.hbm [resolvable:$true] %s42_s1 }
   0x7   :  { %s17_s23 = sshll.u32 %s259_s22, 4  ;;  %s260_s0 = smov [#allocation8]   ;;  %s18_s23 = int_to_ptr.vmem [resolvable:$true] %s17_s23 }
   0x8   :  { %23 = dma.hbm_to_vmem [thread:$0]  %s16_s19, 256, %s18_s23, [#allocation4], %s257_s20, %s257_s20, %s258_s21  }
   0x9   :  { %s44_s26 = sshll.u32 %s260_s0, 4  ;;  %s45_s26 = int_to_ptr.vmem [resolvable:$true] %s44_s26 }
   0xa   :  { %47 = dma.hbm_to_vmem [thread:$0]  %s43_s1, 16, %s45_s26, [#allocation7]  }
   0xb   :  { %250 = dma.done.wait [#allocation4], 256  }
   0xc   :  { %251 = vsyncadd [#allocation4], 4294967040 }
   0xd   :  { %252 = dma.done.wait [#allocation7], 528  }
   0xe   :  { %253 = vsyncadd [#allocation7], 4294966768  ;;  %v73_v0 = vld [vmem:[#allocation6 + $0x18] sm:$0xff]  ;;  %v72_v1 = vld [vmem:[#allocation6 + $0x10] sm:$0xff]  ;;  %vm74_vm0 = vcmask 261120   ;;  %s261_s2 = smov [#allocation9]  }
   0xf   :  { %93 = vmatpush.msra.mxu0 %v73_v0  ;;  %143 = vmatpush.msra.mxu1 %v73_v0  ;;  %v71_v2 = vld [vmem:[#allocation6 + $0x8] sm:$0xff]  ;;  %v70_v3 = vld [vmem:[#allocation6] sm:$0xff]  ;;  %v68_v4 = vld [vmem:[#allocation3] sm:$0xff]  ;;  %s125_s27 = sshll.u32 %s261_s2, 4  ;;  %s127_s30 = sshll.u32 %s306_s3, 4  ;;  %s126_s27 = int_to_ptr.vmem [resolvable:$true] %s125_s27  ;;  %s128_s30 = int_to_ptr.hbm [resolvable:$true] %s127_s30 }
  0x10   :  { %v69_v5 = vld [vmem:[#allocation3 + $0x8] sm:$0xff]  ;;  %v153_v6 = vld [vmem:[#allocation8] ss:$0 sm:$0xff] }
  0x11   :  { %94 = vmatpush.msra.mxu0 %v72_v1  ;;  %144 = vmatpush.msra.mxu1 %v72_v1 }
  0x13   :  { %95 = vmatpush.msra.mxu0 %v71_v2  ;;  %145 = vmatpush.msra.mxu1 %v71_v2 }
  0x15   :  { %96 = vmatpush.msra.mxu0 %v70_v3  ;;  %146 = vmatpush.msra.mxu1 %v70_v3 }
  0x16   :  { %141 = vmatmul.msk.f32.vlgmr.msra.gmra.mxu0 %vm74_vm0, %v68_v4  ;;  %142 = vmatmul.msk.f32.vlgmr.msra.gmra.mxu1 %vm74_vm0, %v69_v5 }
  0x93   :  { %v98_v7 = vpop.f32.mrf.mxu0  ;;  %v101_v8 = vpop.f32.mrf.mxu1 }
  0x94   :  { %v117_v9 = vadd.f32 %v153_v6, %v98_v7  ;;  %v118_v10 = vadd.f32 %v153_v6, %v101_v8 }
  0x96   :  { %119 = vst [vmem:[#allocation9] sm:$0xff] %v117_v9 }
  0x97   :  { %120 = vst [vmem:[#allocation9 + $0x8] sm:$0xff] %v118_v10 }
  0x98   :  { %133 = dma.vmem_to_hbm [thread:$0]  %s126_s27, 256, %s128_s30, [#allocation5], %s257_s20, %s257_s20, %s258_s21  }
  0x99   :  { %254 = dma.done.wait [#allocation5], 256  }
  0x9a   :  { %255 = vsyncadd [#allocation5], 4294967040 }
  0x9b   :  { %138 = vsyncpa [#allocation4], 1 }
  0x9c   :  { %139 = vsyncpa [#allocation7], 1 }
  0x9d   :  { %140 = vsyncpa [#allocation5], 1 }

</bundles_post_ra>
